<compile_context>
chip_gen: v5e
topology: v5e:2x2
jax: 0.10.0
libtpu: 0.0.40
codegen_flags: <defaults>
</compile_context>

<pallas_src>
import functools
import math

import jax
import jax.numpy as jnp
from jax import lax
from jax.experimental import pallas as pl
from jax.experimental.pallas import tpu as pltpu

_NEG_INIT = -1e30  # finite "-inf" so exp(m_prev - m_new) never produces NaN


def _vmem_limit_bytes():
    """Per-generation scoped-VMEM limit: 3/4 of physical, capped at 100 MiB."""
    cap = 64 * 1024 * 1024
    try:
        info = pltpu.get_tpu_info()
        cap = getattr(info, "vmem_capacity_bytes", cap) or cap
    except Exception:
        pass
    return int(min(cap * 3 // 4, 100 * 1024 * 1024))


def _pick_tile(n, preferred):
    """Largest tile from a fixed candidate list that divides n (fallback: n)."""
    for t in (preferred, 512, 256, 128, 64, 32, 16, 8):
        if t <= n and n % t == 0:
            return t
    return n


# ----------------------------------------------------------------------------
# Linear projection kernel: y = x @ W_t + b (bf16 operands, f32 accumulation).
# ----------------------------------------------------------------------------
def _linear_kernel(x_ref, w_ref, b_ref, o_ref):
    y = jnp.dot(x_ref[...], w_ref[...], preferred_element_type=jnp.float32)
    o_ref[...] = (y + b_ref[...]).astype(o_ref.dtype)


def _linear(x2d, w_t, b, *, out_dtype, vmem_limit, row_tile=256):
    M, d_in = x2d.shape
    d_out = w_t.shape[1]
    tm = row_tile if M >= row_tile else M
    return pl.pallas_call(
        _linear_kernel,
        out_shape=jax.ShapeDtypeStruct((M, d_out), out_dtype),
        grid_spec=pltpu.PrefetchScalarGridSpec(
            num_scalar_prefetch=0,
            grid=(pl.cdiv(M, tm),),
            in_specs=[pl.BlockSpec((tm, d_in), lambda i: (i, 0)),
                      pl.BlockSpec((d_in, d_out), lambda i: (0, 0)),
                      pl.BlockSpec((1, d_out), lambda i: (0, 0))],
            out_specs=pl.BlockSpec((tm, d_out), lambda i: (i, 0)),
        ),
        compiler_params=pltpu.CompilerParams(
            dimension_semantics=("parallel",),
            vmem_limit_bytes=vmem_limit,
        ),
    )(x2d, w_t, b)


# ----------------------------------------------------------------------------
# Flash-style multi-head attention kernel with fused output projection.
# Inputs are already-projected Q (pre-scaled), K, V in bf16.
# ----------------------------------------------------------------------------
def _flash_mha_kernel(q_ref, k_ref, v_ref, wo_ref, bo_ref, o_ref,
                      m_ref, l_ref, acc_ref, ctx_ref,
                      *, num_heads, head_dim):
    ki = pl.program_id(2)
    nk = pl.num_programs(2)

    @pl.when(ki == 0)
    def _():
        m_ref[...] = jnp.full(m_ref.shape, _NEG_INIT, dtype=m_ref.dtype)
        l_ref[...] = jnp.zeros(l_ref.shape, dtype=l_ref.dtype)
        acc_ref[...] = jnp.zeros(acc_ref.shape, dtype=acc_ref.dtype)

    # Contract last dims of Q_h and K_h directly (no materialized transpose).
    dims_qk = (((1,), (1,)), ((), ()))

    # Per-head online softmax.  All cross-KV-step state lives in VMEM scratch,
    # so the unrolled head loop keeps only the (TQ, TK) score tile live.
    for h in range(num_heads):
        lo = h * head_dim
        hi = lo + head_dim
        qh = q_ref[0, :, lo:hi]                       # (TQ, hd) bf16 (pre-scaled)
        kh = k_ref[0, :, lo:hi]                       # (TK, hd) bf16
        vh = v_ref[0, :, lo:hi]                       # (TK, hd) bf16

        s = lax.dot_general(qh, kh, dims_qk,
                            preferred_element_type=jnp.float32)       # (TQ, TK)

        m_prev = m_ref[h]                                              # (TQ, 1)
        m_new = jnp.maximum(m_prev, jnp.max(s, axis=-1, keepdims=True))
        alpha = jnp.exp(m_prev - m_new)                                # (TQ, 1)
        p = jnp.exp(s - m_new)                                         # (TQ, TK) f32

        l_ref[h] = alpha * l_ref[h] + jnp.sum(p, axis=-1, keepdims=True)
        acc_ref[h] = alpha * acc_ref[h] + jnp.dot(
            p.astype(jnp.bfloat16), vh, preferred_element_type=jnp.float32)
        m_ref[h] = m_new

    # Final KV step: normalize once per head, assemble lane-dense (TQ, D) ctx,
    # and do a single full-D output-projection matmul.
    @pl.when(ki == nk - 1)
    def _():
        for h in range(num_heads):
            lo = h * head_dim
            hi = lo + head_dim
            inv_l = pl.reciprocal(l_ref[h], approx=True)               # (TQ, 1)
            ctx_ref[:, lo:hi] = (acc_ref[h] * inv_l).astype(jnp.bfloat16)
        out = jnp.dot(ctx_ref[...], wo_ref[...],
                      preferred_element_type=jnp.float32) + bo_ref[...]
        o_ref[0] = out.astype(o_ref.dtype)


def multi_head_attention(query, key, value, params, *, num_heads,
                         q_tile=256, kv_tile=256):
    """query: (B, Sq, D), key/value: (B, Sk, D) float32.  PyTorch-style params."""
    B, Sq, D = query.shape
    _, Sk, _ = key.shape
    assert D % num_heads == 0
    head_dim = D // num_heads
    inv_scale = 1.0 / math.sqrt(head_dim)
    bf = jnp.bfloat16
    vmem_limit = _vmem_limit_bytes()

    # PyTorch Linear: y = x @ W.T + b  ->  pre-transpose to (in, out).
    # Fold the 1/sqrt(head_dim) attention scale into the Q projection.
    wq_t = (params["wq"].T * inv_scale).astype(bf)
    bq_s = (params["bq"] * inv_scale).reshape(1, D).astype(jnp.float32)
    wk_t = params["wk"].T.astype(bf)
    bk = params["bk"].reshape(1, D).astype(jnp.float32)
    wv_t = params["wv"].T.astype(bf)
    bv = params["bv"].reshape(1, D).astype(jnp.float32)
    wo_t = params["wo"].T.astype(bf)
    bo = params["bo"].reshape(1, D).astype(jnp.float32)

    # 1) Hoisted Q/K/V projections -> bf16 activations in HBM.
    q_p = _linear(query.reshape(B * Sq, D).astype(bf), wq_t, bq_s,
                  out_dtype=bf, vmem_limit=vmem_limit).reshape(B, Sq, D)
    k_p = _linear(key.reshape(B * Sk, D).astype(bf), wk_t, bk,
                  out_dtype=bf, vmem_limit=vmem_limit).reshape(B, Sk, D)
    v_p = _linear(value.reshape(B * Sk, D).astype(bf), wv_t, bv,
                  out_dtype=bf, vmem_limit=vmem_limit).reshape(B, Sk, D)

    # 2) Flash attention with fused output projection.
    tq = _pick_tile(Sq, q_tile)
    tk = _pick_tile(Sk, kv_tile)

    kernel = functools.partial(_flash_mha_kernel,
                               num_heads=num_heads, head_dim=head_dim)

    q_spec = pl.BlockSpec((1, tq, D), lambda b, qi, ki: (b, qi, 0))
    kv_spec = pl.BlockSpec((1, tk, D), lambda b, qi, ki: (b, ki, 0))
    wo_spec = pl.BlockSpec((D, D), lambda b, qi, ki: (0, 0))
    bo_spec = pl.BlockSpec((1, D), lambda b, qi, ki: (0, 0))
    o_spec = pl.BlockSpec((1, tq, D), lambda b, qi, ki: (b, qi, 0))

    return pl.pallas_call(
        kernel,
        out_shape=jax.ShapeDtypeStruct((B, Sq, D), query.dtype),
        grid_spec=pltpu.PrefetchScalarGridSpec(
            num_scalar_prefetch=0,
            grid=(B, Sq // tq, Sk // tk),
            in_specs=[q_spec, kv_spec, kv_spec, wo_spec, bo_spec],
            out_specs=o_spec,
            scratch_shapes=[
                pltpu.VMEM((num_heads, tq, 1), jnp.float32),        # running max m
                pltpu.VMEM((num_heads, tq, 1), jnp.float32),        # running sum l
                pltpu.VMEM((num_heads, tq, head_dim), jnp.float32),  # per-head acc
                pltpu.VMEM((tq, D), jnp.bfloat16),                  # assembled ctx
            ],
        ),
        compiler_params=pltpu.CompilerParams(
            # batch + query-tile axes are parallel (v7x megacore); the KV axis
            # carries the online-softmax scratch -> arbitrary.
            dimension_semantics=("parallel", "parallel", "arbitrary"),
            vmem_limit_bytes=vmem_limit,
        ),
    )(q_p, k_p, v_p, wo_t, bo)


def _reference_mha(query, key, value, params, *, num_heads):
    """Pure-JAX f32 reference mirroring the PyTorch forward."""
    B, Sq, D = query.shape
    hd = D // num_heads

    def lin(x, w, b):
        return x @ w.T + b

    Q = lin(query, params["wq"], params["bq"]).reshape(B, Sq, num_heads, hd).transpose(0, 2, 1, 3)
    K = lin(key, params["wk"], params["bk"]).reshape(B, -1, num_heads, hd).transpose(0, 2, 1, 3)
    V = lin(value, params["wv"], params["bv"]).reshape(B, -1, num_heads, hd).transpose(0, 2, 1, 3)
    scores = jnp.einsum("bhqd,bhkd->bhqk", Q, K) / math.sqrt(hd)
    attn = jax.nn.softmax(scores, axis=-1)
    out = jnp.einsum("bhqk,bhkd->bhqd", attn, V)
    out = out.transpose(0, 2, 1, 3).reshape(B, Sq, D)
    return lin(out, params["wo"], params["bo"])


if __name__ == "__main__":
    B, S, D, H = 2, 8, 32, 4  # batch, seq, d_model, num_heads

    root = jax.random.PRNGKey(0)
    keys = jax.random.split(root, 12)
    bound = 1.0 / math.sqrt(D)  # PyTorch default Linear init range

    params = {
        "wq": jax.random.uniform(keys[0], (D, D), jnp.float32, -bound, bound),
        "bq": jax.random.uniform(keys[1], (D,), jnp.float32, -bound, bound),
        "wk": jax.random.uniform(keys[2], (D, D), jnp.float32, -bound, bound),
        "bk": jax.random.uniform(keys[3], (D,), jnp.float32, -bound, bound),
        "wv": jax.random.uniform(keys[4], (D, D), jnp.float32, -bound, bound),
        "bv": jax.random.uniform(keys[5], (D,), jnp.float32, -bound, bound),
        "wo": jax.random.uniform(keys[6], (D, D), jnp.float32, -bound, bound),
        "bo": jax.random.uniform(keys[7], (D,), jnp.float32, -bound, bound),
    }

    query = jax.random.normal(keys[8], (B, S, D), jnp.float32)
    key = jax.random.normal(keys[9], (B, S, D), jnp.float32)
    value = jax.random.normal(keys[10], (B, S, D), jnp.float32)

    out = multi_head_attention(query, key, value, params, num_heads=H)
    out = jax.block_until_ready(out)

    ref = _reference_mha(query, key, value, params, num_heads=H)
    assert out.shape == (B, S, D)
    # bf16 matmul operands (f32 accumulation) + approx reciprocal -> loosened tolerance.
    assert jnp.allclose(out, ref, atol=3e-2, rtol=3e-2), "mismatch vs reference"

    print("KERNEL_OK")
</pallas_src>

<mosaic_0001>
module attributes {stable_mosaic.version = 11 : i64} {
  func.func @_linear_kernel(%arg0: i32, %arg1: memref<16x32xbf16, #tpu.memory_space<vmem>>, %arg2: memref<32x32xbf16, #tpu.memory_space<vmem>>, %arg3: memref<1x32xf32, #tpu.memory_space<vmem>>, %arg4: memref<16x32xbf16, #tpu.memory_space<vmem>>) attributes {dimension_semantics = [#tpu.dimension_semantics<parallel>], iteration_bounds = array<i64: 1>, scalar_prefetch = 0 : i64, scratch_operands = 0 : i64, tpu.core_type = #tpu.core_type<tc>, window_params = [{transform_indices = @transform_0, window_bounds = array<i64: 16, 32>}, {pipeline_mode = #tpu.pipeline_mode<synchronous>, transform_indices = @transform_1, window_bounds = array<i64: 32, 32>}, {pipeline_mode = #tpu.pipeline_mode<synchronous>, transform_indices = @transform_2, window_bounds = array<i64: 1, 32>}, {transform_indices = @transform_3, window_bounds = array<i64: 16, 32>}]} {
    %c0 = arith.constant 0 : index
    %c0_0 = arith.constant 0 : index
    %0 = vector.load %arg1[%c0, %c0_0] : memref<16x32xbf16, #tpu.memory_space<vmem>>, vector<16x32xbf16>
    %c0_1 = arith.constant 0 : index
    %c0_2 = arith.constant 0 : index
    %1 = vector.load %arg2[%c0_1, %c0_2] : memref<32x32xbf16, #tpu.memory_space<vmem>>, vector<32x32xbf16>
    %cst = arith.constant dense<0.000000e+00> : vector<16x32xf32>
    %2 = tpu.matmul %0, %1, %cst {dimension_numbers = #tpu.dot_dimension_numbers<[1], [0], [0], [1], [0, 0, 1, 1], [], []>} : vector<16x32xbf16>, vector<32x32xbf16>, vector<16x32xf32> -> vector<16x32xf32>
    %c0_3 = arith.constant 0 : index
    %c0_4 = arith.constant 0 : index
    %3 = vector.load %arg3[%c0_3, %c0_4] : memref<1x32xf32, #tpu.memory_space<vmem>>, vector<1x32xf32>
    %4 = vector.broadcast %3 : vector<1x32xf32> to vector<16x32xf32>
    %5 = arith.addf %2, %4 : vector<16x32xf32>
    %6 = arith.truncf %5 : vector<16x32xf32> to vector<16x32xbf16>
    %c0_5 = arith.constant 0 : index
    %c0_6 = arith.constant 0 : index
    %7 = vector.load %arg4[%c0_5, %c0_6] : memref<16x32xbf16, #tpu.memory_space<vmem>>, vector<16x32xbf16>
    tpu.vector_store %arg4[%c0_5, %c0_6], %6 {strides = array<i32>} : memref<16x32xbf16, #tpu.memory_space<vmem>>, vector<16x32xbf16>,
    return
  }
  func.func @transform_0(%arg0: i32) -> (i32, i32) {
    %c0_i32 = arith.constant 0 : i32
    %c0_i32_0 = arith.constant 0 : i32
    return %arg0, %c0_i32 : i32, i32
  }
  func.func @transform_1(%arg0: i32) -> (i32, i32) {
    %c0_i32 = arith.constant 0 : i32
    %c0_i32_0 = arith.constant 0 : i32
    %c0_i32_1 = arith.constant 0 : i32
    return %c0_i32, %c0_i32_0 : i32, i32
  }
  func.func @transform_2(%arg0: i32) -> (i32, i32) {
    %c0_i32 = arith.constant 0 : i32
    %c0_i32_0 = arith.constant 0 : i32
    %c0_i32_1 = arith.constant 0 : i32
    return %c0_i32, %c0_i32_0 : i32, i32
  }
  func.func @transform_3(%arg0: i32) -> (i32, i32) {
    %c0_i32 = arith.constant 0 : i32
    %c0_i32_0 = arith.constant 0 : i32
    return %arg0, %c0_i32 : i32, i32
  }
}

</mosaic_0001>

<bundles_post_ra>
// kernel: tpu_custom_call.1
= control target key start
LH: loop header
LB: loop body
LE: loop exit
PB: predicated region body
PF: predicated region fallthrough
CT: control target
= control target key end

     0   :  { %8 = vsyncpa [#allocation3], 0  ;;  %s264_s0 = inlined_call_operand.hbm [shape: bf16[16,32], index: 0, kind: input, shape index: {}]   ;;  %s265_s1 = inlined_call_operand.hbm [shape: bf16[32,32], index: 1, kind: input, shape index: {}]   ;;  %s266_s2 = inlined_call_operand.vmem [shape: f32[1,32], index: 2, kind: input, shape index: {}]   ;;  %s267_s3 = inlined_call_operand.hbm [shape: bf16[16,32], index: 3, kind: output, shape index: {}]  }
   0x1   :  { %9 = vsyncpa [#allocation6], 0 }
   0x2   :  { %10 = vsyncpa [#allocation4], 0  ;;  %s15_s14 = sshll.u32 %s264_s0, 4  ;;  %s218_s15 = smov [#allocation2]   ;;  %s16_s14 = int_to_ptr.hbm [resolvable:$true] %s15_s14 }
   0x3   :  { %s17_s16 = sshll.u32 %s218_s15, 4  ;;  %s28_s19 = sshll.u32 %s265_s1, 4  ;;  %s18_s16 = int_to_ptr.vmem [resolvable:$true] %s17_s16  ;;  %s29_s19 = int_to_ptr.hbm [resolvable:$true] %s28_s19 }
   0x4   :  { %s219_s20 = smov 64   ;;  %s220_s21 = smov 4  }
   0x5   :  { %23 = dma.hbm_to_vmem [thread:$0]  %s16_s14, 128, %s18_s16, [#allocation3], %s219_s20, %s219_s20, %s220_s21  }
   0x6   :  { %s221_s22 = smov [#allocation5]  }
   0x7   :  { %s30_s23 = sshll.u32 %s221_s22, 4  ;;  %s31_s23 = int_to_ptr.vmem [resolvable:$true] %s30_s23 }
   0x8   :  { %36 = dma.hbm_to_vmem [thread:$0]  %s29_s19, 256, %s31_s23, [#allocation6], %s219_s20, %s219_s20, %s220_s21  }
   0x9   :  { %212 = dma.done.wait [#allocation3], 128  }
   0xa   :  { %213 = vsyncadd [#allocation3], 4294967168 }
   0xb   :  { %214 = dma.done.wait [#allocation6], 256  }
   0xc   :  { %215 = vsyncadd [#allocation6], 4294967040  ;;  %v133_v0 = vld [vmem:[#allocation5 + $0x8] sm:$0xff]  ;;  %v132_v1 = vld [vmem:[#allocation5] sm:$0xff]  ;;  %vm75_vm0 = vcmask 261120   ;;  %vm95_vm1 = vcmask 257024  }
   0xd   :  { %85 = vmatpush.bf16.msra.mxu0 %v133_v0  ;;  %v131_v2 = vld [vmem:[#allocation2] sm:$0xff]  ;;  %s222_s24 = smov [#allocation7]   ;;  %s104_s28 = sshll.u32 %s267_s3, 4  ;;  %s105_s28 = int_to_ptr.hbm [resolvable:$true] %s104_s28 }
   0xe   :  { %v139_v3 = vld [vmem:[%s266_s2] ss:$0 sm:$0xff]  ;;  %s102_s25 = sshll.u32 %s222_s24, 4  ;;  %s103_s25 = int_to_ptr.vmem [resolvable:$true] %s102_s25 }
  0x11   :  { %86 = vmatpush.bf16.msra.mxu0 %v132_v1 }
  0x14   :  { %130 = vmatmul.msk.bf16.vlgmr.msra.gmra.mxu0 %vm75_vm0, %v131_v2 }
  0x91   :  { %v88_v4 = vpop.f32.mrf.mxu0 }
  0x92   :  { %v89_v5 = vadd.f32 %v139_v3, %v88_v4 }
  0x94   :  { %v93_v6 = vpack.c.bf16 %v89_v5, %v89_v5 }
  0x96   :  { %96 = vst.msk [vmem:[#allocation7] sm:$0xf] %vm95_vm1, %v93_v6 }
  0x99   :  { %v90_v7 = vpop.f32.mrf.mxu0 }
  0x9a   :  { %v91_v8 = vadd.f32 %v139_v3, %v90_v7 }
  0x9c   :  { %v94_v9 = vpack.c.bf16 %v91_v8, %v91_v8 }
  0x9e   :  { %97 = vst.msk [vmem:[#allocation7 + $0x4] sm:$0xf] %vm95_vm1, %v94_v9 }
  0x9f   :  { %110 = dma.vmem_to_hbm [thread:$0]  %s103_s25, 128, %s105_s28, [#allocation4], %s219_s20, %s219_s20, %s220_s21  }
  0xa0   :  { %216 = dma.done.wait [#allocation4], 128  }
  0xa1   :  { %217 = vsyncadd [#allocation4], 4294967168 }
  0xa2   :  { %115 = vsyncpa [#allocation3], 1 }
  0xa3   :  { %116 = vsyncpa [#allocation6], 1 }
  0xa4   :  { %117 = vsyncpa [#allocation4], 1 }

</bundles_post_ra>
